<compile_context>
chip_gen: v6e
topology: v6e:2x2x1
jax: 0.10.0
libtpu: 0.0.40
codegen_flags: <defaults>
</compile_context>

<pallas_src>
import math

import jax
import jax.numpy as jnp
from jax.experimental import pallas as pl
from jax.experimental.pallas import tpu as pltpu

# ---- small, TPU-friendly toy shapes consistent with the module ----
B = 8              # batch
C = 128            # backbone final_in_features (real nfnet: 3072)
H = W = 8          # backbone output spatial size (real: 7)
FC_DIM = 64        # fc_dim (real: 512)
N_CLASSES = 256    # n_classes (real: 11014)
CLASS_TILE = 128   # class tile TN (use 2048, a multiple of 256, at real N)
NUM_SPLITS = 2     # class-dim shards across TensorCores (v7x megacore);
                   # harmless sequential loop on single-TC v5e/v6e

SCALE = 30.0
MARGIN = 0.5
BN_EPS = 1e-5
NEG_BIG = -1e30

COS_M = math.cos(MARGIN)
SIN_M = math.sin(MARGIN)
TH = math.cos(math.pi - MARGIN)
MM = math.sin(math.pi - MARGIN) * MARGIN


def _make_kernel(n_classes: int, tn: int, tiles_per_split: int, num_splits: int):
    """Build the class-tiled Shopee head kernel.

    grid = (num_splits, tiles_per_split); axis 0 is "parallel" (sharded across
    TensorCores on megacore parts), axis 1 is the "arbitrary" class-tile loop
    carrying the online-logsumexp state.
    """
    has_pad = (num_splits * tiles_per_split * tn) != n_classes

    def kernel(label_ref, pooled_ref, fc_w_ref, fc_b_ref, bn_g_ref, bn_b_ref,
               arc_w_ref, logits_ref, m_out_ref, l_out_ref, t_out_ref,
               xnb_ref, m_ref, l_ref, tgt_ref):
        i = pl.program_id(0)   # class-dim split (parallel across cores)
        j = pl.program_id(1)   # class tile within the split (arbitrary)

        # ---- once per split: pooled -> fc -> bn -> L2-normalize, cache bf16 ----
        @pl.when(j == 0)
        def _init():
            # Dropout(p=0.0) == identity; Linear(C -> FC_DIM)
            x = jnp.dot(pooled_ref[...], fc_w_ref[...],
                        preferred_element_type=jnp.float32) + fc_b_ref[...]
            # BatchNorm1d, training-mode batch mean / biased batch var
            mu = jnp.mean(x, axis=0, keepdims=True)
            xc = x - mu
            var = jnp.mean(xc * xc, axis=0, keepdims=True)
            x = xc * jax.lax.rsqrt(var + BN_EPS)
            x = x * bn_g_ref[...] + bn_b_ref[...]
            # F.normalize(input): row-wise L2 with eps clamp (rsqrt -> EUP)
            sumsq = jnp.sum(x * x, axis=1, keepdims=True)
            xn = x * jax.lax.rsqrt(jnp.maximum(sumsq, 1e-24))
            xnb_ref[...] = xn.astype(jnp.bfloat16)       # cached bf16 embedding
            m_ref[...] = jnp.full_like(m_ref, -jnp.inf)
            l_ref[...] = jnp.zeros_like(l_ref)
            tgt_ref[...] = jnp.zeros_like(tgt_ref)

        # ---- ArcMarginProduct on this class tile ----
        # Weight arrives already L2-normalized (folded in the wrapper), padded
        # along the class dim, transposed and cast to bf16; f32 MXU accumulate.
        cosine = jnp.dot(xnb_ref[...], arc_w_ref[...],
                         preferred_element_type=jnp.float32)     # (B, TN)
        # clamp: |cosine| can exceed 1 by rounding -> avoid NaN in sqrt
        sine = jnp.sqrt(jnp.clip(1.0 - cosine * cosine, 0.0, 1.0))
        phi = cosine * COS_M - sine * SIN_M
        phi = jnp.where(cosine > TH, phi, cosine - MM)           # easy_margin=False

        tile_start = (i * tiles_per_split + j) * tn
        col = jax.lax.broadcasted_iota(jnp.int32, cosine.shape, 1) + tile_start
        is_tgt = col == label_ref[...]                           # scatter_ one-hot
        out = jnp.where(is_tgt, phi, cosine) * SCALE             # ls_eps = 0.0
        if has_pad:
            # padded classes exist only in the very last tile; the select is a
            # no-op elsewhere and absent entirely when N is tile-aligned.
            out = jnp.where(col < n_classes, out, NEG_BIG)
        logits_ref[...] = out

        # ---- nn.CrossEntropyLoss: online logsumexp across class tiles ----
        m_new = jnp.maximum(m_ref[...], jnp.max(out, axis=1, keepdims=True))
        alpha = jnp.exp(m_ref[...] - m_new)
        l_ref[...] = alpha * l_ref[...] + jnp.sum(jnp.exp(out - m_new),
                                                  axis=1, keepdims=True)
        m_ref[...] = m_new
        tgt_ref[...] = tgt_ref[...] + jnp.sum(jnp.where(is_tgt, out, 0.0),
                                              axis=1, keepdims=True)

        # emit this split's partial LSE state; combined in the wrapper
        @pl.when(j == pl.num_programs(1) - 1)
        def _finalize():
            m_out_ref[0] = m_ref[...]
            l_out_ref[0] = l_ref[...]
            t_out_ref[0] = tgt_ref[...]

    return kernel


def _vmem_cap_bytes() -> int:
    """Generation-aware VMEM cap: ~75% of physical VMEM (v5e/v6e 128 MiB,
    v7x 64 MiB), falling back to a v7x-safe 48 MiB."""
    try:
        return int(pltpu.get_tpu_info().vmem_capacity_bytes) * 3 // 4
    except Exception:
        return 48 << 20


def shopee_forward(feat_nchw, label, fc_w, fc_b, bn_g, bn_b, arc_w,
                   *, class_tile=CLASS_TILE, num_splits=NUM_SPLITS):
    """feat_nchw: (B, C, H, W) backbone feature maps; label: (B,) int.
    Weights in PyTorch convention: fc_w (FC_DIM, C), fc_b/bn_g/bn_b (FC_DIM,),
    arc_w (N_CLASSES, FC_DIM).  Returns (logits (B, N_CLASSES), loss scalar)."""
    b, c, h, w = feat_nchw.shape
    n_classes, fc_dim = arc_w.shape
    tn = class_tile
    span = tn * num_splits
    n_pad = ((n_classes + span - 1) // span) * span
    tiles_per_split = n_pad // span

    # AdaptiveAvgPool2d(1).view(B, -1): one XLA reduce in the wrapper.  No
    # transpose pass, and the kernel's largest input shrinks to (B, C).
    pooled = jnp.mean(jnp.asarray(feat_nchw, jnp.float32), axis=(2, 3))  # (B, C)

    label2d = jnp.asarray(label, jnp.int32).reshape(b, 1)
    fc_w_t = jnp.asarray(fc_w, jnp.float32).T                    # (C, FC_DIM)
    fc_b2 = jnp.asarray(fc_b, jnp.float32).reshape(1, fc_dim)
    bn_g2 = jnp.asarray(bn_g, jnp.float32).reshape(1, fc_dim)
    bn_b2 = jnp.asarray(bn_b, jnp.float32).reshape(1, fc_dim)

    # F.normalize(weight) folded into the streamed weight itself: normalize in
    # f32, zero-pad the class dim, transpose, cast to bf16 (halves the dominant
    # HBM stream; rounding happens after normalization).
    arc_w32 = jnp.asarray(arc_w, jnp.float32)                    # (N, FC_DIM)
    arc_wn = arc_w32 * jax.lax.rsqrt(
        jnp.maximum(jnp.sum(arc_w32 * arc_w32, axis=1, keepdims=True), 1e-24))
    arc_w_t = jnp.pad(arc_wn, ((0, n_pad - n_classes), (0, 0))
                      ).T.astype(jnp.bfloat16)                   # (FC_DIM, N_PAD)

    # VMEM budget: single-buffered constants + scratch + double-buffered
    # class-tile streams (arc_w tile, logits tile) + slack for compiler scratch.
    resident = 4 * (b + b * c + c * fc_dim + 3 * fc_dim)
    scratch = 2 * b * fc_dim + 3 * 4 * b
    streamed = 2 * (2 * fc_dim * tn + 4 * b * tn) + 2 * 3 * 4 * b
    vmem_limit = int(min(_vmem_cap_bytes(),
                         max(16 << 20, resident + scratch + streamed + (4 << 20))))

    cost = pl.CostEstimate(
        flops=int(2 * b * c * fc_dim * num_splits + 2 * b * fc_dim * n_pad),
        transcendentals=int(2 * b * n_pad),
        bytes_accessed=int(pooled.size * 4 + fc_w_t.size * 4
                           + arc_w_t.size * 2 + b * n_pad * 4),
    )

    def _const(shape):
        # constant-index input: never re-fetched, single-buffered to save VMEM
        return pl.BlockSpec(shape, lambda i, j: (0,) * len(shape),
                            pipeline_mode=pl.Buffered(1))

    logits_pad, m_part, l_part, t_part = pl.pallas_call(
        _make_kernel(n_classes, tn, tiles_per_split, num_splits),
        out_shape=(jax.ShapeDtypeStruct((b, n_pad), jnp.float32),
                   jax.ShapeDtypeStruct((num_splits, b, 1), jnp.float32),
                   jax.ShapeDtypeStruct((num_splits, b, 1), jnp.float32),
                   jax.ShapeDtypeStruct((num_splits, b, 1), jnp.float32)),
        grid=(num_splits, tiles_per_split),
        in_specs=[
            _const((b, 1)),                                       # labels
            _const((b, c)),                                       # pooled features
            _const((c, fc_dim)),                                  # fc weight^T
            _const((1, fc_dim)),                                  # fc bias
            _const((1, fc_dim)),                                  # bn gamma
            _const((1, fc_dim)),                                  # bn beta
            pl.BlockSpec((fc_dim, tn),                            # normalized arc W^T (bf16)
                         lambda i, j: (0, i * tiles_per_split + j)),
        ],
        out_specs=(
            pl.BlockSpec((b, tn), lambda i, j: (0, i * tiles_per_split + j)),
            pl.BlockSpec((1, b, 1), lambda i, j: (i, 0, 0)),      # partial max
            pl.BlockSpec((1, b, 1), lambda i, j: (i, 0, 0)),      # partial sum(exp)
            pl.BlockSpec((1, b, 1), lambda i, j: (i, 0, 0)),      # partial target logit
        ),
        scratch_shapes=[
            pltpu.VMEM((b, fc_dim), jnp.bfloat16),  # L2-normalized embedding (bf16)
            pltpu.VMEM((b, 1), jnp.float32),        # running row max
            pltpu.VMEM((b, 1), jnp.float32),        # running sum(exp)
            pltpu.VMEM((b, 1), jnp.float32),        # target-logit accumulator
        ],
        compiler_params=pltpu.CompilerParams(
            dimension_semantics=("parallel", "arbitrary"),
            vmem_limit_bytes=vmem_limit,
        ),
        cost_estimate=cost,
    )(label2d, pooled, fc_w_t, fc_b2, bn_g2, bn_b2, arc_w_t)

    # combine the per-split online-logsumexp partials into CrossEntropyLoss
    m_all = jnp.max(m_part, axis=0)                               # (B, 1)
    l_all = jnp.sum(l_part * jnp.exp(m_part - m_all), axis=0)     # (B, 1)
    lse = m_all + jnp.log(l_all)
    tgt = jnp.sum(t_part, axis=0)
    loss = jnp.mean(lse - tgt)

    return logits_pad[:, :n_classes], loss


if __name__ == "__main__":
    key = jax.random.PRNGKey(0)
    k_feat, k_lab, k_fc, k_arc = jax.random.split(key, 4)

    # "image" stand-in: backbone output feature maps (see TODO above).
    feat = jax.random.normal(k_feat, (B, C, H, W), dtype=jnp.float32)
    label = jax.random.randint(k_lab, (B,), 0, N_CLASSES, dtype=jnp.int32)

    # Deterministic parameter init matching the module's init schemes.
    # fc: xavier_normal_, bias 0
    fc_std = math.sqrt(2.0 / (C + FC_DIM))
    fc_w = fc_std * jax.random.normal(k_fc, (FC_DIM, C), dtype=jnp.float32)
    fc_b = jnp.zeros((FC_DIM,), jnp.float32)
    # bn: weight 1, bias 0
    bn_g = jnp.ones((FC_DIM,), jnp.float32)
    bn_b = jnp.zeros((FC_DIM,), jnp.float32)
    # arcface weight: xavier_uniform_
    arc_bound = math.sqrt(6.0 / (FC_DIM + N_CLASSES))
    arc_w = jax.random.uniform(k_arc, (N_CLASSES, FC_DIM), jnp.float32,
                               minval=-arc_bound, maxval=arc_bound)

    logits, loss = shopee_forward(feat, label, fc_w, fc_b, bn_g, bn_b, arc_w)
    jax.block_until_ready((logits, loss))
    assert logits.shape == (B, N_CLASSES)
    assert bool(jnp.all(jnp.isfinite(logits)))
    assert bool(jnp.isfinite(loss))
    print("KERNEL_OK")
</pallas_src>

<mosaic_0001>
module attributes {stable_mosaic.version = 11 : i64} {
  func.func @kernel(%arg0: i32, %arg1: i32, %arg2: memref<8x1xi32, #tpu.memory_space<vmem>>, %arg3: memref<8x128xf32, #tpu.memory_space<vmem>>, %arg4: memref<128x64xf32, #tpu.memory_space<vmem>>, %arg5: memref<1x64xf32, #tpu.memory_space<vmem>>, %arg6: memref<1x64xf32, #tpu.memory_space<vmem>>, %arg7: memref<1x64xf32, #tpu.memory_space<vmem>>, %arg8: memref<64x128xbf16, #tpu.memory_space<vmem>>, %arg9: memref<8x128xf32, #tpu.memory_space<vmem>>, %arg10: memref<1x8x1xf32, #tpu.memory_space<vmem>>, %arg11: memref<1x8x1xf32, #tpu.memory_space<vmem>>, %arg12: memref<1x8x1xf32, #tpu.memory_space<vmem>>, %arg13: memref<8x64xbf16, #tpu.memory_space<vmem>>, %arg14: memref<8x1xf32, #tpu.memory_space<vmem>>, %arg15: memref<8x1xf32, #tpu.memory_space<vmem>>, %arg16: memref<8x1xf32, #tpu.memory_space<vmem>>) attributes {dimension_semantics = [#tpu.dimension_semantics<parallel>, #tpu.dimension_semantics<arbitrary>], iteration_bounds = array<i64: 2, 1>, scalar_prefetch = 0 : i64, scratch_operands = 4 : i64, tpu.core_type = #tpu.core_type<tc>, window_params = [{pipeline_mode = #tpu.pipeline_mode<synchronous>, transform_indices = @transform_0, window_bounds = array<i64: 8, 1>}, {pipeline_mode = #tpu.pipeline_mode<synchronous>, transform_indices = @transform_1, window_bounds = array<i64: 8, 128>}, {pipeline_mode = #tpu.pipeline_mode<synchronous>, transform_indices = @transform_2, window_bounds = array<i64: 128, 64>}, {pipeline_mode = #tpu.pipeline_mode<synchronous>, transform_indices = @transform_3, window_bounds = array<i64: 1, 64>}, {pipeline_mode = #tpu.pipeline_mode<synchronous>, transform_indices = @transform_4, window_bounds = array<i64: 1, 64>}, {pipeline_mode = #tpu.pipeline_mode<synchronous>, transform_indices = @transform_5, window_bounds = array<i64: 1, 64>}, {transform_indices = @transform_6, window_bounds = array<i64: 64, 128>}, {transform_indices = @transform_7, window_bounds = array<i64: 8, 128>}, {transform_indices = @transform_8, window_bounds = array<i64: 1, 8, 1>}, {transform_indices = @transform_9, window_bounds = array<i64: 1, 8, 1>}, {transform_indices = @transform_10, window_bounds = array<i64: 1, 8, 1>}]} {
    %c0_i32 = arith.constant 0 : i32
    %0 = arith.cmpi eq, %arg1, %c0_i32 : i32
    %1 = arith.extui %0 : i1 to i32
    %c0_i32_0 = arith.constant 0 : i32
    %2 = arith.cmpi ne, %1, %c0_i32_0 : i32
    scf.if %2 {
      %c0_36 = arith.constant 0 : index
      %c0_37 = arith.constant 0 : index
      %64 = vector.load %arg3[%c0_36, %c0_37] : memref<8x128xf32, #tpu.memory_space<vmem>>, vector<8x128xf32>
      %c0_38 = arith.constant 0 : index
      %c0_39 = arith.constant 0 : index
      %65 = vector.load %arg4[%c0_38, %c0_39] : memref<128x64xf32, #tpu.memory_space<vmem>>, vector<128x64xf32>
      %cst_40 = arith.constant dense<0.000000e+00> : vector<8x64xf32>
      %66 = tpu.matmul %64, %65, %cst_40 {dimension_numbers = #tpu.dot_dimension_numbers<[1], [0], [0], [1], [0, 0, 1, 1], [], []>} : vector<8x128xf32>, vector<128x64xf32>, vector<8x64xf32> -> vector<8x64xf32>
      %c0_41 = arith.constant 0 : index
      %c0_42 = arith.constant 0 : index
      %67 = vector.load %arg5[%c0_41, %c0_42] : memref<1x64xf32, #tpu.memory_space<vmem>>, vector<1x64xf32>
      %68 = vector.broadcast %67 : vector<1x64xf32> to vector<8x64xf32>
      %69 = arith.addf %66, %68 : vector<8x64xf32>
      %cst_43 = arith.constant dense<0.000000e+00> : vector<64xf32>
      %70 = vector.multi_reduction <add>, %69, %cst_43 [0] : vector<8x64xf32> to vector<64xf32>
      %71 = vector.shape_cast %70 : vector<64xf32> to vector<1x64xf32>
      %cst_44 = arith.constant 8.000000e+00 : f32
      %72 = vector.broadcast %cst_44 : f32 to vector<1x64xf32>
      %73 = arith.divf %71, %72 : vector<1x64xf32>
      %74 = vector.broadcast %73 : vector<1x64xf32> to vector<8x64xf32>
      %75 = arith.subf %69, %74 : vector<8x64xf32>
      %76 = arith.mulf %75, %75 : vector<8x64xf32>
      %cst_45 = arith.constant dense<0.000000e+00> : vector<64xf32>
      %77 = vector.multi_reduction <add>, %76, %cst_45 [0] : vector<8x64xf32> to vector<64xf32>
      %78 = vector.shape_cast %77 : vector<64xf32> to vector<1x64xf32>
      %cst_46 = arith.constant 8.000000e+00 : f32
      %79 = vector.broadcast %cst_46 : f32 to vector<1x64xf32>
      %80 = arith.divf %78, %79 : vector<1x64xf32>
      %cst_47 = arith.constant 9.99999974E-6 : f32
      %81 = vector.broadcast %cst_47 : f32 to vector<1x64xf32>
      %82 = arith.addf %80, %81 : vector<1x64xf32>
      %83 = math.rsqrt %82 : vector<1x64xf32>
      %84 = vector.broadcast %83 : vector<1x64xf32> to vector<8x64xf32>
      %85 = arith.mulf %75, %84 : vector<8x64xf32>
      %c0_48 = arith.constant 0 : index
      %c0_49 = arith.constant 0 : index
      %86 = vector.load %arg6[%c0_48, %c0_49] : memref<1x64xf32, #tpu.memory_space<vmem>>, vector<1x64xf32>
      %87 = vector.broadcast %86 : vector<1x64xf32> to vector<8x64xf32>
      %88 = arith.mulf %85, %87 : vector<8x64xf32>
      %c0_50 = arith.constant 0 : index
      %c0_51 = arith.constant 0 : index
      %89 = vector.load %arg7[%c0_50, %c0_51] : memref<1x64xf32, #tpu.memory_space<vmem>>, vector<1x64xf32>
      %90 = vector.broadcast %89 : vector<1x64xf32> to vector<8x64xf32>
      %91 = arith.addf %88, %90 : vector<8x64xf32>
      %92 = arith.mulf %91, %91 : vector<8x64xf32>
      %cst_52 = arith.constant dense<0.000000e+00> : vector<8xf32>
      %93 = vector.multi_reduction <add>, %92, %cst_52 [1] : vector<8x64xf32> to vector<8xf32>
      %94 = vector.shape_cast %93 : vector<8xf32> to vector<8x1xf32>
      %cst_53 = arith.constant 1.000000e-24 : f32
      %95 = vector.broadcast %cst_53 : f32 to vector<8x1xf32>
      %96 = arith.maximumf %94, %95 : vector<8x1xf32>
      %97 = math.rsqrt %96 : vector<8x1xf32>
      %98 = vector.broadcast %97 : vector<8x1xf32> to vector<8x64xf32>
      %99 = arith.mulf %91, %98 : vector<8x64xf32>
      %100 = arith.truncf %99 : vector<8x64xf32> to vector<8x64xbf16>
      %c0_54 = arith.constant 0 : index
      %c0_55 = arith.constant 0 : index
      %101 = vector.load %arg13[%c0_54, %c0_55] : memref<8x64xbf16, #tpu.memory_space<vmem>>, vector<8x64xbf16>
      tpu.vector_store %arg13[%c0_54, %c0_55], %100 {strides = array<i32>} : memref<8x64xbf16, #tpu.memory_space<vmem>>, vector<8x64xbf16>,
      %cst_56 = arith.constant 0xFF800000 : f32
      %102 = vector.broadcast %cst_56 : f32 to vector<8x1xf32>
      %c0_57 = arith.constant 0 : index
      %c0_58 = arith.constant 0 : index
      %103 = vector.load %arg14[%c0_57, %c0_58] : memref<8x1xf32, #tpu.memory_space<vmem>>, vector<8x1xf32>
      tpu.vector_store %arg14[%c0_57, %c0_58], %102 {strides = array<i32>} : memref<8x1xf32, #tpu.memory_space<vmem>>, vector<8x1xf32>,
      %cst_59 = arith.constant 0.000000e+00 : f32
      %104 = vector.broadcast %cst_59 : f32 to vector<8x1xf32>
      %c0_60 = arith.constant 0 : index
      %c0_61 = arith.constant 0 : index
      %105 = vector.load %arg15[%c0_60, %c0_61] : memref<8x1xf32, #tpu.memory_space<vmem>>, vector<8x1xf32>
      tpu.vector_store %arg15[%c0_60, %c0_61], %104 {strides = array<i32>} : memref<8x1xf32, #tpu.memory_space<vmem>>, vector<8x1xf32>,
      %cst_62 = arith.constant 0.000000e+00 : f32
      %106 = vector.broadcast %cst_62 : f32 to vector<8x1xf32>
      %c0_63 = arith.constant 0 : index
      %c0_64 = arith.constant 0 : index
      %107 = vector.load %arg16[%c0_63, %c0_64] : memref<8x1xf32, #tpu.memory_space<vmem>>, vector<8x1xf32>
      tpu.vector_store %arg16[%c0_63, %c0_64], %106 {strides = array<i32>} : memref<8x1xf32, #tpu.memory_space<vmem>>, vector<8x1xf32>,
    } else {
    }
    %c0 = arith.constant 0 : index
    %c0_1 = arith.constant 0 : index
    %3 = vector.load %arg13[%c0, %c0_1] : memref<8x64xbf16, #tpu.memory_space<vmem>>, vector<8x64xbf16>
    %c0_2 = arith.constant 0 : index
    %c0_3 = arith.constant 0 : index
    %4 = vector.load %arg8[%c0_2, %c0_3] : memref<64x128xbf16, #tpu.memory_space<vmem>>, vector<64x128xbf16>
    %cst = arith.constant dense<0.000000e+00> : vector<8x128xf32>
    %5 = tpu.matmul %3, %4, %cst {dimension_numbers = #tpu.dot_dimension_numbers<[1], [0], [0], [1], [0, 0, 1, 1], [], []>} : vector<8x64xbf16>, vector<64x128xbf16>, vector<8x128xf32> -> vector<8x128xf32>
    %6 = arith.mulf %5, %5 : vector<8x128xf32>
    %cst_4 = arith.constant 1.000000e+00 : f32
    %7 = vector.broadcast %cst_4 : f32 to vector<8x128xf32>
    %8 = arith.subf %7, %6 : vector<8x128xf32>
    %cst_5 = arith.constant 0.000000e+00 : f32
    %cst_6 = arith.constant 1.000000e+00 : f32
    %9 = vector.broadcast %cst_5 : f32 to vector<8x128xf32>
    %10 = arith.maximumf %9, %8 : vector<8x128xf32>
    %11 = vector.broadcast %cst_6 : f32 to vector<8x128xf32>
    %12 = arith.minimumf %11, %10 : vector<8x128xf32>
    %13 = math.sqrt %12 : vector<8x128xf32>
    %cst_7 = arith.constant 0.87758255 : f32
    %14 = vector.broadcast %cst_7 : f32 to vector<8x128xf32>
    %15 = arith.mulf %5, %14 : vector<8x128xf32>
    %cst_8 = arith.constant 0.47942555 : f32
    %16 = vector.broadcast %cst_8 : f32 to vector<8x128xf32>
    %17 = arith.mulf %13, %16 : vector<8x128xf32>
    %18 = arith.subf %15, %17 : vector<8x128xf32>
    %cst_9 = arith.constant -0.87758255 : f32
    %19 = vector.broadcast %cst_9 : f32 to vector<8x128xf32>
    %20 = arith.cmpf ogt, %5, %19 : vector<8x128xf32>
    %cst_10 = arith.constant 0.239712775 : f32
    %21 = vector.broadcast %cst_10 : f32 to vector<8x128xf32>
    %22 = arith.subf %5, %21 : vector<8x128xf32>
    %23 = arith.select %20, %18, %22 : vector<8x128xi1>, vector<8x128xf32>
    %c1_i32 = arith.constant 1 : i32
    %24 = arith.muli %arg0, %c1_i32 : i32
    %25 = arith.addi %24, %arg1 : i32
    %c128_i32 = arith.constant 128 : i32
    %26 = arith.muli %25, %c128_i32 : i32
    %27 = tpu.iota {dimensions = array<i32: 1>} : vector<8x128xi32>
    %28 = vector.broadcast %26 : i32 to vector<8x128xi32>
    %29 = arith.addi %27, %28 : vector<8x128xi32>
    %c0_11 = arith.constant 0 : index
    %c0_12 = arith.constant 0 : index
    %30 = vector.load %arg2[%c0_11, %c0_12] : memref<8x1xi32, #tpu.memory_space<vmem>>, vector<8x1xi32>
    %31 = vector.broadcast %30 : vector<8x1xi32> to vector<8x128xi32>
    %32 = arith.cmpi eq, %29, %31 : vector<8x128xi32>
    %33 = arith.select %32, %23, %5 : vector<8x128xi1>, vector<8x128xf32>
    %cst_13 = arith.constant 3.000000e+01 : f32
    %34 = vector.broadcast %cst_13 : f32 to vector<8x128xf32>
    %35 = arith.mulf %33, %34 : vector<8x128xf32>
    %c0_14 = arith.constant 0 : index
    %c0_15 = arith.constant 0 : index
    %36 = vector.load %arg9[%c0_14, %c0_15] : memref<8x128xf32, #tpu.memory_space<vmem>>, vector<8x128xf32>
    tpu.vector_store %arg9[%c0_14, %c0_15], %35 {strides = array<i32>} : memref<8x128xf32, #tpu.memory_space<vmem>>, vector<8x128xf32>,
    %c0_16 = arith.constant 0 : index
    %c0_17 = arith.constant 0 : index
    %37 = vector.load %arg14[%c0_16, %c0_17] : memref<8x1xf32, #tpu.memory_space<vmem>>, vector<8x1xf32>
    %cst_18 = arith.constant dense<0xFF800000> : vector<8xf32>
    %38 = vector.multi_reduction <maximumf>, %35, %cst_18 [1] : vector<8x128xf32> to vector<8xf32>
    %39 = vector.shape_cast %38 : vector<8xf32> to vector<8x1xf32>
    %40 = arith.maximumf %37, %39 : vector<8x1xf32>
    %c0_19 = arith.constant 0 : index
    %c0_20 = arith.constant 0 : index
    %41 = vector.load %arg14[%c0_19, %c0_20] : memref<8x1xf32, #tpu.memory_space<vmem>>, vector<8x1xf32>
    %42 = arith.subf %41, %40 : vector<8x1xf32>
    %43 = math.exp %42 : vector<8x1xf32>
    %c0_21 = arith.constant 0 : index
    %c0_22 = arith.constant 0 : index
    %44 = vector.load %arg15[%c0_21, %c0_22] : memref<8x1xf32, #tpu.memory_space<vmem>>, vector<8x1xf32>
    %45 = arith.mulf %43, %44 : vector<8x1xf32>
    %46 = vector.broadcast %40 : vector<8x1xf32> to vector<8x128xf32>
    %47 = arith.subf %35, %46 : vector<8x128xf32>
    %48 = math.exp %47 : vector<8x128xf32>
    %cst_23 = arith.constant dense<0.000000e+00> : vector<8xf32>
    %49 = vector.multi_reduction <add>, %48, %cst_23 [1] : vector<8x128xf32> to vector<8xf32>
    %50 = vector.shape_cast %49 : vector<8xf32> to vector<8x1xf32>
    %51 = arith.addf %45, %50 : vector<8x1xf32>
    %c0_24 = arith.constant 0 : index
    %c0_25 = arith.constant 0 : index
    %52 = vector.load %arg15[%c0_24, %c0_25] : memref<8x1xf32, #tpu.memory_space<vmem>>, vector<8x1xf32>
    tpu.vector_store %arg15[%c0_24, %c0_25], %51 {strides = array<i32>} : memref<8x1xf32, #tpu.memory_space<vmem>>, vector<8x1xf32>,
    %c0_26 = arith.constant 0 : index
    %c0_27 = arith.constant 0 : index
    %53 = vector.load %arg14[%c0_26, %c0_27] : memref<8x1xf32, #tpu.memory_space<vmem>>, vector<8x1xf32>
    tpu.vector_store %arg14[%c0_26, %c0_27], %40 {strides = array<i32>} : memref<8x1xf32, #tpu.memory_space<vmem>>, vector<8x1xf32>,
    %c0_28 = arith.constant 0 : index
    %c0_29 = arith.constant 0 : index
    %54 = vector.load %arg16[%c0_28, %c0_29] : memref<8x1xf32, #tpu.memory_space<vmem>>, vector<8x1xf32>
    %cst_30 = arith.constant 0.000000e+00 : f32
    %55 = vector.broadcast %cst_30 : f32 to vector<8x128xf32>
    %56 = arith.select %32, %35, %55 : vector<8x128xi1>, vector<8x128xf32>
    %cst_31 = arith.constant dense<0.000000e+00> : vector<8xf32>
    %57 = vector.multi_reduction <add>, %56, %cst_31 [1] : vector<8x128xf32> to vector<8xf32>
    %58 = vector.shape_cast %57 : vector<8xf32> to vector<8x1xf32>
    %59 = arith.addf %54, %58 : vector<8x1xf32>
    %c0_32 = arith.constant 0 : index
    %c0_33 = arith.constant 0 : index
    %60 = vector.load %arg16[%c0_32, %c0_33] : memref<8x1xf32, #tpu.memory_space<vmem>>, vector<8x1xf32>
    tpu.vector_store %arg16[%c0_32, %c0_33], %59 {strides = array<i32>} : memref<8x1xf32, #tpu.memory_space<vmem>>, vector<8x1xf32>,
    %c0_i32_34 = arith.constant 0 : i32
    %61 = arith.cmpi eq, %arg1, %c0_i32_34 : i32
    %62 = arith.extui %61 : i1 to i32
    %c0_i32_35 = arith.constant 0 : i32
    %63 = arith.cmpi ne, %62, %c0_i32_35 : i32
    scf.if %63 {
      %c0_36 = arith.constant 0 : index
      %c0_37 = arith.constant 0 : index
      %64 = vector.load %arg14[%c0_36, %c0_37] : memref<8x1xf32, #tpu.memory_space<vmem>>, vector<8x1xf32>
      %c0_38 = arith.constant 0 : index
      %c0_39 = arith.constant 0 : index
      %c0_40 = arith.constant 0 : index
      %65 = vector.load %arg10[%c0_38, %c0_39, %c0_40] : memref<1x8x1xf32, #tpu.memory_space<vmem>>, vector<1x8x1xf32>
      %66 = vector.shape_cast %65 : vector<1x8x1xf32> to vector<8x1xf32>
      %67 = vector.shape_cast %64 : vector<8x1xf32> to vector<1x8x1xf32>
      tpu.vector_store %arg10[%c0_38, %c0_39, %c0_40], %67 {strides = array<i32>} : memref<1x8x1xf32, #tpu.memory_space<vmem>>, vector<1x8x1xf32>,
      %c0_41 = arith.constant 0 : index
      %c0_42 = arith.constant 0 : index
      %68 = vector.load %arg15[%c0_41, %c0_42] : memref<8x1xf32, #tpu.memory_space<vmem>>, vector<8x1xf32>
      %c0_43 = arith.constant 0 : index
      %c0_44 = arith.constant 0 : index
      %c0_45 = arith.constant 0 : index
      %69 = vector.load %arg11[%c0_43, %c0_44, %c0_45] : memref<1x8x1xf32, #tpu.memory_space<vmem>>, vector<1x8x1xf32>
      %70 = vector.shape_cast %69 : vector<1x8x1xf32> to vector<8x1xf32>
      %71 = vector.shape_cast %68 : vector<8x1xf32> to vector<1x8x1xf32>
      tpu.vector_store %arg11[%c0_43, %c0_44, %c0_45], %71 {strides = array<i32>} : memref<1x8x1xf32, #tpu.memory_space<vmem>>, vector<1x8x1xf32>,
      %c0_46 = arith.constant 0 : index
      %c0_47 = arith.constant 0 : index
      %72 = vector.load %arg16[%c0_46, %c0_47] : memref<8x1xf32, #tpu.memory_space<vmem>>, vector<8x1xf32>
      %c0_48 = arith.constant 0 : index
      %c0_49 = arith.constant 0 : index
      %c0_50 = arith.constant 0 : index
      %73 = vector.load %arg12[%c0_48, %c0_49, %c0_50] : memref<1x8x1xf32, #tpu.memory_space<vmem>>, vector<1x8x1xf32>
      %74 = vector.shape_cast %73 : vector<1x8x1xf32> to vector<8x1xf32>
      %75 = vector.shape_cast %72 : vector<8x1xf32> to vector<1x8x1xf32>
      tpu.vector_store %arg12[%c0_48, %c0_49, %c0_50], %75 {strides = array<i32>} : memref<1x8x1xf32, #tpu.memory_space<vmem>>, vector<1x8x1xf32>,
    } else {
    }
    return
  }
  func.func @transform_0(%arg0: i32, %arg1: i32) -> (i32, i32) {
    %c0_i32 = arith.constant 0 : i32
    %c0_i32_0 = arith.constant 0 : i32
    %c0_i32_1 = arith.constant 0 : i32
    return %c0_i32, %c0_i32_0 : i32, i32
  }
  func.func @transform_1(%arg0: i32, %arg1: i32) -> (i32, i32) {
    %c0_i32 = arith.constant 0 : i32
    %c0_i32_0 = arith.constant 0 : i32
    %c0_i32_1 = arith.constant 0 : i32
    return %c0_i32, %c0_i32_0 : i32, i32
  }
  func.func @transform_2(%arg0: i32, %arg1: i32) -> (i32, i32) {
    %c0_i32 = arith.constant 0 : i32
    %c0_i32_0 = arith.constant 0 : i32
    %c0_i32_1 = arith.constant 0 : i32
    return %c0_i32, %c0_i32_0 : i32, i32
  }
  func.func @transform_3(%arg0: i32, %arg1: i32) -> (i32, i32) {
    %c0_i32 = arith.constant 0 : i32
    %c0_i32_0 = arith.constant 0 : i32
    %c0_i32_1 = arith.constant 0 : i32
    return %c0_i32, %c0_i32_0 : i32, i32
  }
  func.func @transform_4(%arg0: i32, %arg1: i32) -> (i32, i32) {
    %c0_i32 = arith.constant 0 : i32
    %c0_i32_0 = arith.constant 0 : i32
    %c0_i32_1 = arith.constant 0 : i32
    return %c0_i32, %c0_i32_0 : i32, i32
  }
  func.func @transform_5(%arg0: i32, %arg1: i32) -> (i32, i32) {
    %c0_i32 = arith.constant 0 : i32
    %c0_i32_0 = arith.constant 0 : i32
    %c0_i32_1 = arith.constant 0 : i32
    return %c0_i32, %c0_i32_0 : i32, i32
  }
  func.func @transform_6(%arg0: i32, %arg1: i32) -> (i32, i32) {
    %c1_i32 = arith.constant 1 : i32
    %0 = arith.muli %arg0, %c1_i32 : i32
    %1 = arith.addi %0, %arg1 : i32
    %c0_i32 = arith.constant 0 : i32
    %c0_i32_0 = arith.constant 0 : i32
    return %c0_i32, %1 : i32, i32
  }
  func.func @transform_7(%arg0: i32, %arg1: i32) -> (i32, i32) {
    %c1_i32 = arith.constant 1 : i32
    %0 = arith.muli %arg0, %c1_i32 : i32
    %1 = arith.addi %0, %arg1 : i32
    %c0_i32 = arith.constant 0 : i32
    %c0_i32_0 = arith.constant 0 : i32
    return %c0_i32, %1 : i32, i32
  }
  func.func @transform_8(%arg0: i32, %arg1: i32) -> (i32, i32, i32) {
    %c0_i32 = arith.constant 0 : i32
    %c0_i32_0 = arith.constant 0 : i32
    %c0_i32_1 = arith.constant 0 : i32
    return %arg0, %c0_i32, %c0_i32_0 : i32, i32, i32
  }
  func.func @transform_9(%arg0: i32, %arg1: i32) -> (i32, i32, i32) {
    %c0_i32 = arith.constant 0 : i32
    %c0_i32_0 = arith.constant 0 : i32
    %c0_i32_1 = arith.constant 0 : i32
    return %arg0, %c0_i32, %c0_i32_0 : i32, i32, i32
  }
  func.func @transform_10(%arg0: i32, %arg1: i32) -> (i32, i32, i32) {
    %c0_i32 = arith.constant 0 : i32
    %c0_i32_0 = arith.constant 0 : i32
    %c0_i32_1 = arith.constant 0 : i32
    return %arg0, %c0_i32, %c0_i32_0 : i32, i32, i32
  }
}

</mosaic_0001>

<bundles_post_ra>
// kernel: tpu_custom_call.1
= control target key start
LH: loop header
LB: loop body
LE: loop exit
PB: predicated region body
PF: predicated region fallthrough
CT: control target
= control target key end

     0   :  { %s1501_s0 = inlined_call_operand.vmem [shape: s32[8,1], index: 0, kind: input, shape index: {}]   ;;  %s1502_s1 = inlined_call_operand.vmem [shape: f32[8,128], index: 1, kind: input, shape index: {}]   ;;  %s1503_s2 = inlined_call_operand.vmem [shape: f32[128,64], index: 2, kind: input, shape index: {}]   ;;  %s1504_s3 = inlined_call_operand.vmem [shape: f32[1,64], index: 3, kind: input, shape index: {}]   ;;  %s1505_s4 = inlined_call_operand.vmem [shape: f32[1,64], index: 4, kind: input, shape index: {}]   ;;  %s1506_s5 = inlined_call_operand.vmem [shape: f32[1,64], index: 5, kind: input, shape index: {}]   ;;  %s1507_s6 = inlined_call_operand.vmem [shape: bf16[64,256], index: 6, kind: input, shape index: {}]   ;;  %s1508_s7 = inlined_call_operand.hbm [shape: f32[8,256], index: 7, kind: output, shape index: {0}]   ;;  %s1509_s8 = inlined_call_operand.vmem [shape: f32[2,8,1], index: 8, kind: output, shape index: {1}]   ;;  %s1510_s9 = inlined_call_operand.vmem [shape: f32[2,8,1], index: 9, kind: output, shape index: {2}]   ;;  %s1511_s10 = inlined_call_operand.vmem [shape: f32[2,8,1], index: 10, kind: output, shape index: {3}]  }
   0x1   :  { %1514 = sst [smem:[#allocation10_spill]] %s1501_s0 }
   0x2   :  { %1515 = sst [smem:[#allocation11_spill]] %s1502_s1 }
   0x3   :  { %1516 = sst [smem:[#allocation12_spill]] %s1503_s2 }
   0x4   :  { %16 = vsyncpa [#allocation8], 0 }
   0x5   :  { %18 = vsyncpa [#allocation8 + $0x1], 0  ;;  %s1268_s13 = smov 0   ;;  %s1270_s14 = smov 0  }
   0x6   :  { %s1272_s15 = smov 0   ;;  %s1274_s16 = smov 0  }
   0x7   :  { %s1276_s17 = smov 0   ;;  %s1278_s18 = smov 0  }
   0x8 LB: > { %s960_s19 = sadd.s32 4294967295, %s1206_s18   ;;  %s961_s20 = sadd.s32 4294967294, %s1206_s18   ;;  %s1206_s18 = sphi %s1278_s18, %s24_s18   ;;  %s1202_s17 = sphi %s1276_s17, %s1528_s17   ;;  %s1198_s16 = sphi %s1274_s16, %s1527_s16   ;;  %s1194_s15 = sphi %s1272_s15, %s1526_s15   ;;  %s1190_s14 = sphi %s1270_s14, %s1525_s14   ;;  %s1186_s13 = sphi %s1268_s13, %s1524_s13  }
   0x9   : > { %s36_s21 = sadd.s32 1, %s1202_s17  ;;  %s171_s22 = sadd.s32 1, %s1194_s15 }
   0xa   : > { %p38_p0 = scmp.ge.s32.totalorder %s36_s21, 2  ;;  %p178_p1 = scmp.ne.s32.totalorder %s1194_s15, %s1190_s14 }
   0xb   : > { %p179_p2 = scmp.eq.s32.totalorder %s1206_s18, 0  ;;  %p210_p3 = scmp.eq.s32.totalorder %s960_s19, 1 }
   0xc   : > { %s1530_s21 = smov (%p38_p0, %s36_s21), 0  ;;  %p215_p6 = scmp.ne.s32.totalorder %s1190_s14, %s1186_s13 }
   0xd   : > { %p180_p4 = por %p179_p2, %p178_p1  ;;  %p1307_p5 = por %p210_p3, %p178_p1 }
   0xe   : > { %s168_s24 = ssub.s32 %s1202_s17, %s1530_s21  ;;  %p216_p8 = scmp.eq.s32.totalorder %s961_s20, 1 }
   0xf   : > { %p169_p7 = scmp.eq.s32.totalorder %s168_s24, 0  ;;  %p1513_p10 = scmp.ge.s32.totalorder %s1206_s18, 2 }
  0x10   : > { %p1318_p9 = por %p216_p8, %p215_p6 }
  0x11   : > { %s1316_s25 = scalar_select %p169_p7, %s1194_s15, %s171_s22  }
  0x12   : > { %328 = sbr.rel (%p1513_p10) target bundleno = 32 (0x20), region = 40 }
  0x17   : > { %331 = sbr.rel (!%p180_p4) target bundleno = 32 (0x20), region = 44  ;;  %s333_s27 = sand.u32 (%p180_p4), 1, %s1194_s15  }
  0x18   : > { %s965_s28 = sshll.u32 (%p180_p4), %s1202_s17, 2  ;;  %s964_s29 = sshll.u32 (%p180_p4), %s333_s27, 5 }
  0x19   : > { %s338_s12 = scalar_lea.vmem (%p180_p4), %s1507_s6, %s965_s28  ;;  %s335_s19 = scalar_lea.vmem (%p180_p4), [#allocation6], %s964_s29 }
  0x1a   : > { %v355_v0 = vld [vmem:[%s338_s12] sm:$0xf] (%p180_p4)  ;;  %v357_v1 = vld [vmem:[%s338_s12 + $0x8] sm:$0xf] (%p180_p4)  ;;  %v359_v2 = vld [vmem:[%s338_s12 + $0x10] sm:$0xf] (%p180_p4) }
  0x1b   : > { %356 = vst [vmem:[%s335_s19] sm:$0xf] (%p180_p4), %v355_v0  ;;  %358 = vst [vmem:[%s335_s19 + $0x4] sm:$0xf] (%p180_p4), %v357_v1  ;;  %v361_v3 = vld [vmem:[%s338_s12 + $0x18] sm:$0xf] (%p180_p4) }
  0x1c   : > { %v363_v4 = vld [vmem:[%s338_s12 + $0x20] sm:$0xf]  ;;  %360 = vst [vmem:[%s335_s19 + $0x8] sm:$0xf] %v359_v2  ;;  %362 = vst [vmem:[%s335_s19 + $0xc] sm:$0xf] %v361_v3 }
  0x1d   : > { %364 = vst [vmem:[%s335_s19 + $0x10] sm:$0xf] %v363_v4  ;;  %v365_v5 = vld [vmem:[%s338_s12 + $0x28] sm:$0xf]  ;;  %v367_v6 = vld [vmem:[%s338_s12 + $0x30] sm:$0xf] }
  0x1e   : > { %v369_v7 = vld [vmem:[%s338_s12 + $0x38] sm:$0xf]  ;;  %366 = vst [vmem:[%s335_s19 + $0x14] sm:$0xf] %v365_v5  ;;  %368 = vst [vmem:[%s335_s19 + $0x18] sm:$0xf] %v367_v6 }
  0x1f   : > { %370 = vst [vmem:[%s335_s19 + $0x1c] sm:$0xf] %v369_v7 }
  0x20 PF: > { %p966_p11 = scmp.ge.s32.totalorder %s1206_s18, 1  ;;  %p409_p12 = scmp.lt.s32.totalorder %s1206_s18, 3 }
  0x22   : > { %p410_p13 = pnand %p966_p11, %p409_p12 }
  0x23   : > { %s1519_s2 = sld [smem:[#allocation12_spill]] (!%p410_p13)  ;;  %s1415_s20 = sand.u32 (!%p410_p13), 1, %s1190_s14  }
  0x24   : > { %413 = sbr.rel (%p410_p13) target bundleno = 1152 (0x480), region = 85  ;;  %s1520_s1 = sld [smem:[#allocation11_spill]] (!%p410_p13) }
  0x25   : > { %s967_s22 = sshll.u32 (!%p410_p13), %s1415_s20, 5  ;;  %s1521_s0 = sld [smem:[#allocation10_spill]] (!%p410_p13) }
  0x26   : > { %s418_s24 = scalar_lea.vmem (!%p410_p13), [#allocation6], %s967_s22  ;;  %s1512_s29 = sshll.u32 (!%p410_p13), %s1198_s16, 7 }
  0x27   : > { %s968_s30 = sshll.u32 (!%p410_p13), %s1415_s20, 3  ;;  %p467_p0 = scmp.lt.s32.totalorder (!%p410_p13), %s1198_s16, 1 }
  0x28   : > { %s1434_s11 = scalar_lea.vmem (!%p410_p13), [#allocation7], %s968_s30  ;;  %s1522_s22 = sshll.u32 (!%p410_p13), %s1198_s16, 7 }
  0x29   : > { %v500_v8 = vld [vmem:[%s1519_s2 + $0x78] sm:$0xff]  ;;  %v1208_v9 = vmov 0.0   ;;  %v499_v10 = vld [vmem:[%s1519_s2 + $0x70] sm:$0xff]  ;;  %vm1209_vm0 = vmmov 0   ;;  %v498_v11 = vld [vmem:[%s1519_s2 + $0x68] sm:$0xff]  ;;  %vm578_vm1 = vcmask 523264   ;;  %s802_s28 = scalar_lea.hbm %s1508_s7, %s1522_s22 }
  0x2a   : > { %1008 = vmatprep.subr.mxu0 %v1208_v9  ;;  %1040 = vmatprep.mubr.msk.f32.mxu0 %vm1209_vm0, %v1208_v9  ;;  %v497_v12 = vld [vmem:[%s1519_s2 + $0x60] sm:$0xff]  ;;  %v496_v13 = vld [vmem:[%s1519_s2 + $0x58] sm:$0xff]  ;;  %v495_v14 = vld [vmem:[%s1519_s2 + $0x50] sm:$0xff]  ;;  %v1210_v62 = vmov 0   ;;  %vm625_vm2 = vcmask 519168   ;;  %vm627_vm3 = vcmask 7168  }
  0x2b   : > { %1009 = vmatpush3.msra.mxu0 %v500_v8  ;;  %1043 = vmatprep.subr.bf16.mxu1 %v1208_v9  ;;  %v494_v15 = vld [vmem:[%s1519_s2 + $0x48] sm:$0xff]  ;;  %v493_v16 = vld [vmem:[%s1519_s2 + $0x40] sm:$0xff]  ;;  %v492_v17 = vld [vmem:[%s1519_s2 + $0x38] sm:$0xff]  ;;  %v1211_v5 = vmov -inf   ;;  %629 = vst.msk [vmem:[#allocation4] sm:$0xff] %vm627_vm3, %v1208_v9  ;;  %s468_s12 = scalar_select %p467_p0, %s1198_s16, 1 }
  0x2c   : > { %1010 = vmatprep.subr.mxu0 %v1208_v9  ;;  %1051 = vmatprep.mubr.msk.bf16.mxu1 %vm1209_vm0, %v1208_v9  ;;  %v491_v18 = vld [vmem:[%s1519_s2 + $0x30] sm:$0xff]  ;;  %v490_v19 = vld [vmem:[%s1519_s2 + $0x28] sm:$0xff]  ;;  %v489_v20 = vld [vmem:[%s1519_s2 + $0x20] sm:$0xff]  ;;  %628 = vst.msk [vmem:[#allocation3] sm:$0xff] %vm627_vm3, %v1211_v5  ;;  %s778_s30 = scalar_lea.sflag [#allocation8], %s1415_s20 }
  0x2d   : > { %1011 = vmatpush3.msra.mxu0 %v499_v10  ;;  %v488_v21 = vld [vmem:[%s1519_s2 + $0x18] sm:$0xff]  ;;  %v487_v22 = vld [vmem:[%s1519_s2 + $0x10] sm:$0xff]  ;;  %v486_v23 = vld [vmem:[%s1519_s2 + $0x8] sm:$0xff]  ;;  %1114 = vset.pattern.permute.xlu0 %v1210_v62  ;;  %630 = vst.msk [vmem:[#allocation5] sm:$0xff] %vm627_vm3, %v1208_v9  ;;  %s1441_s19 = sshll.u32 %s468_s12, 3  ;;  %s804_s12 = sshll.u32 %s1434_s11, 4  ;;  %s805_s12 = int_to_ptr.vmem [resolvable:$true] %s804_s12 }
  0x2e   : > { %1012 = vmatprep.subr.mxu0 %v1208_v9  ;;  %v485_v24 = vld [vmem:[%s1519_s2] sm:$0xff]  ;;  %v1116_v57 = vld [vmem:[%s418_s24 + $0x18] sm:$0xff]   ;;  %v1117_v58 = vld [vmem:[%s418_s24 + $0x10] sm:$0xff]   ;;  %1115 = vset.pattern.permute.xlu1 %v1210_v62  ;;  %s470_s27 = scalar_lea.vmem %s1509_s8, %s1441_s19 }
  0x2f   : > { %1013 = vmatpush3.msra.mxu0 %v498_v11  ;;  %v484_v25 = vld [vmem:[%s1520_s1] sm:$0xff]  ;;  %1044 = vmatpush3.bf16.msra.mxu1 %v1116_v57  ;;  %s1130_s1 = scalar_lea.vmem %s805_s12, 128 }
  0x30   : > { %1014 = vmatprep.subr.mxu0 %v1208_v9  ;;  %v972_v26 = vld [vmem:[%s1504_s3] ss:$0 sm:$0xff]  ;;  %1045 = vmatprep.subr.bf16.mxu1 %v1208_v9  ;;  %v1118_v59 = vld [vmem:[%s418_s24 + $0x8] sm:$0xff]   ;;  %p1131_p1 = scmp.ne.s32.totalorder %s805_s12, %s1130_s1 }
  0x31   : > { %1015 = vmatpush3.msra.mxu0 %v497_v12  ;;  %v973_v50 = vld [vmem:[%s1505_s4] ss:$0 sm:$0xff] }
  0x32   : > { %1016 = vmatprep.subr.mxu0 %v1208_v9  ;;  %v974_v52 = vld [vmem:[%s1506_s5] ss:$0 sm:$0xff]  ;;  %p1132_p2 = pnand %p1131_p1, %p1307_p5 }
  0x33   : > { %1017 = vmatpush3.msra.mxu0 %v496_v13  ;;  %1046 = vmatpush3.bf16.msra.mxu1 %v1117_v58  ;;  %v1119_v60 = vld [vmem:[%s418_s24] sm:$0xff]  }
  0x34   : > { %1018 = vmatprep.subr.mxu0 %v1208_v9  ;;  %1047 = vmatprep.subr.bf16.mxu1 %v1208_v9  ;;  %v731_v61 = vld [vmem:[%s1521_s0] sm:$0xff]  ;;  %p1133_p3 = pneg %p1132_p2 }
  0x35   : > { %1019 = vmatpush3.msra.mxu0 %v495_v14 }
  0x36   : > { %1020 = vmatprep.subr.mxu0 %v1208_v9 }
  0x37   : > { %1021 = vmatpush3.msra.mxu0 %v494_v15  ;;  %1048 = vmatpush3.bf16.msra.mxu1 %v1118_v59  ;;  %v727_v15 = vlaneseq }
  0x38   : > { %1022 = vmatprep.subr.mxu0 %v1208_v9  ;;  %1049 = vmatprep.subr.bf16.mxu1 %v1208_v9 }
  0x39   : > { %1023 = vmatpush3.msra.mxu0 %v493_v16  ;;  %v728_v16 = vand.u32 127, %v727_v15 }
  0x3a   : > { %1024 = vmatprep.subr.mxu0 %v1208_v9 }
  0x3b   : > { %1025 = vmatpush3.msra.mxu0 %v492_v17  ;;  %1050 = vmatpush3.bf16.msra.mxu1 %v1119_v60 }
  0x3c   : > { %1026 = vmatprep.subr.mxu0 %v1208_v9 }
  0x3d   : > { %1027 = vmatpush3.msra.mxu0 %v491_v18  ;;  %v729_v18 = vstv %s1512_s29  ;;  %s478_s29 = scalar_lea.vmem %s1511_s10, %s1441_s19 }
  0x3e   : > { %1028 = vmatprep.subr.mxu0 %v1208_v9 }
  0x3f   : > { %1029 = vmatpush3.msra.mxu0 %v490_v19 }
  0x40   : > { %1030 = vmatprep.subr.mxu0 %v1208_v9 }
  0x41   : > { %1031 = vmatpush3.msra.mxu0 %v489_v20 }
  0x42   : > { %1032 = vmatprep.subr.mxu0 %v1208_v9 }
  0x43   : > { %1033 = vmatpush3.msra.mxu0 %v488_v21 }
  0x44   : > { %1034 = vmatprep.subr.mxu0 %v1208_v9 }
  0x45   : > { %1035 = vmatpush3.msra.mxu0 %v487_v22 }
  0x46   : > { %1036 = vmatprep.subr.mxu0 %v1208_v9 }
  0x47   : > { %1037 = vmatpush3.msra.mxu0 %v486_v23 }
  0x48   : > { %1038 = vmatprep.subr.mxu0 %v1208_v9  ;;  %v730_v9 = vadd.s32 %v729_v18, %v728_v16 }
  0x49   : > { %1039 = vmatpush3.msra.mxu0 %v485_v24 }
  0x4a   : > { %1041 = vmatmul.mubr.f32.vlgmr.msra.gmra.mxu0 %v484_v25 }
 0x10a   : > { %v574_v27 = vpop.f32.mrf.mxu0 }
 0x10b   : > { %v575_v28 = vadd.f32 %v972_v26, %v574_v27 }
 0x10c   : > { %v1042_v29 = vpop.f32.mrf.mxu0 }
 0x10d   : > { %v579_v30 = vsel %vm578_vm1, %v575_v28, 0.0 }
 0x10e   : > { %v580_v31 = vrot.slane %v579_v30, 4 }
 0x110   : > { %v581_v32 = vadd.f32 %v580_v31, %v579_v30 }
 0x112   : > { %v582_v33 = vrot.slane %v581_v32, 2 }
 0x114   : > { %v583_v34 = vadd.f32 %v582_v33, %v581_v32  ;;  %v739_v32 = vld [vmem:[#allocation3] sm:$0xff]  ;;  %v762_v33 = vld [vmem:[#allocation5] sm:$0xff] }
 0x116   : > { %v584_v35 = vrot.slane %v583_v34, 1 }
 0x118   : > { %v585_v36 = vadd.f32 %v584_v35, %v583_v34 }
 0x11a   : > { %v587_v37 = vmul.f32 0.125, %v585_v36 }
 0x11c   : > { %v588_v38 = vsub.f32 %v575_v28, %v587_v37 }
 0x11e   : > { %v589_v39 = vmul.f32 %v588_v38, %v588_v38 }
 0x120   : > { %v590_v40 = vsel %vm578_vm1, %v589_v39, 0.0 }
 0x121   : > { %v591_v41 = vrot.slane %v590_v40, 4 }
 0x123   : > { %v592_v42 = vadd.f32 %v591_v41, %v590_v40 }
 0x125   : > { %v593_v43 = vrot.slane %v592_v42, 2 }
 0x127   : > { %v594_v44 = vadd.f32 %v593_v43, %v592_v42 }
 0x129   : > { %v595_v45 = vrot.slane %v594_v44, 1 }
 0x12b   : > { %v596_v46 = vadd.f32 %v595_v45, %v594_v44 }
 0x12d   : > { %v597_v47 = vmul.f32 0.125, %v596_v46 }
 0x12f   : > { %v598_v48 = vadd.f32 1e-05, %v597_v47 }
 0x131   : > { %1120 = vrsqrt.f32 %v598_v48 }
 0x13e   : > { %v1121_v49 = vpop.eup %1120 }
 0x13f   : > { %v600_v51 = vmul.f32 %v1121_v49, %v588_v38 }
 0x141   : > { %v608_v53 = vmul.f32 %v973_v50, %v600_v51 }
 0x143   : > { %v616_v54 = vadd.f32 %v974_v52, %v608_v53 }
 0x145   : > { %v617_v55 = vmul.f32 %v616_v54, %v616_v54 }
 0x147   : > { %v618_v56 = vsel %vm578_vm1, %v617_v55, 0.0 }
 0x148   : > { %619 = vadd.xlane.f32.xlu0 %v618_v56 }
 0x15e   : > { %733 = vperm.xlu0 %1114, %v731_v61  }
 0x1d1   : > { %v620_v63 = vpop.xlane.xlu0 %619 }
 0x1d2   : > { %v621_v0 = vmax.f32 %v620_v63, 1e-24 }
 0x1d4   : > { %1122 = vrsqrt.f32 %v621_v0 }
 0x1d9   : > { %v734_v22 = vpop.permute.xlu0 %733 }
 0x1da   : > { %vm735_vm6 = vcmp.eq.s32.totalorder %v730_v9, %v734_v22 }
 0x1e1   : > { %v1123_v1 = vpop.eup %1122 }
 0x1e2   : > { %v623_v2 = vmul.f32 %v1123_v1, %v616_v54 }
 0x1e4   : > { %v624_v3 = vpack.c.bf16 %v623_v2, %v623_v2 }
 0x1e6   : > { %626 = vst.msk [vmem:[#allocation2] sm:$0xf] %vm625_vm2, %v624_v3 }
 0x1ed   : > { %v631_v4 = vld [vmem:[#allocation2] sm:$0xf] }
 0x1ee   : > { %1052 = vmatmul.mubr.msk.bf16.vlgmr.msra.gmra.mxu1 %vm578_vm1, %v631_v4 }
 0x2ae   : > { %v702_v6 = vpop.f32.mrf.mxu1 }
 0x2af   : > { %v708_v7 = vmul.f32 %v702_v6, %v702_v6  ;;  %v719_v24 = vmul.f32 0.87758255, %v702_v6  ;;  %v980_v26 = vadd.f32 -0.23971277, %v702_v6  ;;  %vm722_vm7 = vcmp.gt.f32.partialorder %v702_v6, -0.87758255 }
 0x2b0   : > { %v1053_v8 = vpop.f32.mrf.mxu1 }
 0x2b1   : > { %v709_v10 = vsub.f32 1.0, %v708_v7 }
 0x2b2   : > { %v705_v11 = vpop.f32.mrf.mxu1 }
 0x2b3   : > { %v710_v12 = vmax.f32 %v709_v10, 0.0 }
 0x2b4   : > { %v1054_v13 = vpop.f32.mrf.mxu1 }
 0x2b5   : > { %v711_v14 = vmin.f32 %v710_v12, 1.0 }
 0x2b7   : > { %1124 = vrsqrt.f32 %v711_v14  ;;  %vm714_vm4 = vcmp.eq.f32.partialorder %v711_v14, inf  ;;  %v717_v20 = vand.u32 2147483648, %v711_v14  ;;  %vm716_vm5 = vcmp.eq.f32.partialorder %v711_v14, 0.0 }
 0x2c4   : > { %v1125_v17 = vpop.eup %1124 }
 0x2c5   : > { %v713_v19 = vmul.f32 %v1125_v17, %v711_v14 }
 0x2c7   : > { %v715_v21 = vsel %vm714_vm4, %v711_v14, %v713_v19 }
 0x2c8   : > { %v718_v23 = vsel %vm716_vm5, %v717_v20, %v715_v21 }
 0x2c9   : > { %v720_v25 = vmul.f32 0.47942555, %v718_v23 }
 0x2cb   : > { %v721_v27 = vsub.f32 %v719_v24, %v720_v25 }
 0x2cd   : > { %v724_v28 = vsel %vm722_vm7, %v721_v27, %v980_v26 }
 0x2ce   : > { %v736_v29 = vsel %vm735_vm6, %v724_v28, %v702_v6 }
 0x2cf   : > { %v737_v30 = vmul.f32 30.0, %v736_v29 }
 0x2d1   : > { %740 = vmax.xlane.f32.xlu1 %v737_v30  ;;  %v763_v31 = vsel %vm735_vm6, %v737_v30, 0.0  ;;  %738 = vst [vmem:[%s1434_s11] sm:$0xff] %v737_v30 }
 0x2d2   : > { %764 = vadd.xlane.f32.xlu0 %v763_v31 }
 0x35a   : > { %v741_v34 = vpop.xlane.xlu1 %740 }
 0x35b   : > { %v742_v35 = vmax.f32 %v739_v32, %v741_v34  ;;  %v765_v36 = vpop.xlane.xlu0 %764 }
 0x35c   : > { %v766_v37 = vadd.f32 %v765_v36, %v762_v33 }
 0x35d   : > { %v743_v38 = vsub.f32 %v739_v32, %v742_v35  ;;  %761 = vst.msk [vmem:[#allocation3] sm:$0xff] %vm627_vm3, %v742_v35  ;;  %750 = vperm.xlu1 %1115, %v742_v35  }
 0x35e   : > { %767 = vst.msk [vmem:[#allocation5] sm:$0xff] %vm627_vm3, %v766_v37 }
 0x364   : > { %v771_v39 = vld [vmem:[#allocation3] sm:$0xff] }
 0x365   : > { %772 = vst.msk [vmem:[%s470_s27] sm:$0xff] %vm627_vm3, %v771_v39  ;;  %v775_v40 = vld [vmem:[#allocation5] sm:$0xff] }
 0x366   : > { %776 = vst.msk [vmem:[%s478_s29] sm:$0xff] %vm627_vm3, %v775_v40  ;;  %s1212_s29 = smov [#allocation7]  }
 0x367   : > { %s1134_s27 = sshll.u32 %s1212_s29, 4  ;;  %s1135_s27 = int_to_ptr.vmem [resolvable:$false] %s1134_s27 }
 0x368   : > { %s1136_s2 = scalar_lea.vmem %s1135_s27, 256  ;;  %p1137_p4 = scmp.lt.s32.totalorder %s805_s12, %s1135_s27 }
 0x369   : > { %p1138_p6 = scmp.lt.s32.totalorder %s1136_s2, %s1130_s1 }
 0x36b   : > { %p1139_p7 = por %p1138_p6, %p1137_p4 }
 0x36d   : > { %p1140_p8 = pnand %p1139_p7, %p1133_p3 }
 0x3d8   : > { %v751_v41 = vpop.permute.xlu1 %750 }
 0x3d9   : > { %v753_v42 = vsub.f32 %v737_v30, %v751_v41 }
 0x3db   : > { %v754_v43 = vmul.f32 1.442695, %v753_v42 }
 0x3dd   : > { %1126 = vpow2.f32 %v754_v43 }
 0x3ea   : > { %v1127_v44 = vpop.eup %1126 }
 0x3eb   : > { %756 = vadd.xlane.f32.xlu1 %v1127_v44 }
 0x3ec   : > { %1143 = shalt.err (!%p1140_p8)
}
 0x3ed   : > { %s1144_s16 = scalar_lea.hbm %s802_s28, 128  ;;  %s1148_s11 = scalar_lea.hbm %s1508_s7, 256 }
 0x3ee   : > { %p1145_p11 = scmp.ne.s32.totalorder %s802_s28, %s1144_s16  ;;  %p1149_p0 = scmp.lt.s32.totalorder %s802_s28, %s1508_s7 }
 0x3ef   : > { %p1150_p1 = scmp.lt.s32.totalorder %s1148_s11, %s1144_s16 }
 0x3f0   : > { %p1146_p12 = pnand %p1145_p11, %p1307_p5 }
 0x3f1   : > { %p1151_p2 = por %p1150_p1, %p1149_p0 }
 0x3f2   : > { %p1147_p13 = pneg %p1146_p12 }
 0x3f4   : > { %p1152_p10 = pnand %p1151_p2, %p1147_p13 }
 0x3f6   : > { %1155 = shalt.err (!%p1152_p10)
}
 0x3f7   : > { %1055 = dma.vmem_to_hbm [thread:$0]  (%p1307_p5), %s805_s12, 128, %s802_s28, %s778_s30   ;;  %v744_v45 = vmul.f32 1.442695, %v743_v38  ;;  %v746_v47 = vld [vmem:[#allocation4] sm:$0xff] }
 0x3f8   : > { %s474_s29 = scalar_lea.vmem %s1510_s9, %s1441_s19 }
 0x3f9   : > { %1128 = vpow2.f32 %v744_v45 }
 0x406   : > { %v1129_v46 = vpop.eup %1128 }
 0x407   : > { %v747_v48 = vmul.f32 %v1129_v46, %v746_v47 }
 0x474   : > { %v757_v49 = vpop.xlane.xlu1 %756 }
 0x475   : > { %v758_v50 = vadd.f32 %v757_v49, %v747_v48 }
 0x477   : > { %760 = vst.msk [vmem:[#allocation4] sm:$0xff] %vm627_vm3, %v758_v50 }
 0x47e   : > { %v773_v51 = vld [vmem:[#allocation4] sm:$0xff] }
 0x47f   : > { %774 = vst.msk [vmem:[%s474_s29] sm:$0xff] %vm627_vm3, %v773_v51 }
 0x480 PF: > { %s825_s23 = sand.u32 1, %s1186_s13   ;;  %p1523_p5 = scmp.ge.s32.totalorder %s1206_s18, 2 }
 0x481   : > { %s826_s12 = scalar_lea.sflag [#allocation8], %s825_s23 }
 0x482   : > { %p1058_p10 = pnand %p1523_p5, %p1318_p9 }
 0x484   : > { %p1059_p3 = pneg %p1058_p10 }
 0x486   : > { %1181 = dma.done.wait (%p1059_p3), %s826_s12, 128  }
 0x487   : > { %1183 = vsyncadd (%p1059_p3), %s826_s12, 4294967168  ;;  %s24_s18 = sadd.s32 1, %s1206_s18   ;;  %s1524_s13 = smov %s1190_s14 }
 0x488   : > { %p21_p4 = scmp.ge.s32.totalorder %s24_s18, 4   ;;  %s1525_s14 = smov %s1194_s15 }
 0x489   : > { %s1526_s15 = smov %s1316_s25  ;;  %s1527_s16 = smov %s1202_s17 }
 0x48a   : > { %s1528_s17 = smov %s1530_s21  ;;  %23 = sbr.rel (!%p21_p4) target bundleno = 8 (0x8), region = 173 }
 0x48f   :  { %852 = vsyncpa [#allocation8], 1 }
 0x490   :  { %854 = vsyncpa [#allocation8 + $0x1], 1 }

</bundles_post_ra>
